<compile_context>
chip_gen: v6e
topology: v6e:2x2x1
jax: 0.10.0
libtpu: 0.0.40
codegen_flags: <defaults>
</compile_context>

<pallas_src>
import functools

import jax
import jax.numpy as jnp
from jax.experimental import pallas as pl
from jax.experimental.pallas import tpu as pltpu


def _scaling_kernel(x_ref, inv_scale_ref, bias_ref, o_ref):
    # x_ref/o_ref: (R, T) tile; inv_scale/bias: (R, 1) f32, broadcast along lanes.
    # Compute the affine in f32; cast only on the store (exact for f32 inputs).
    x = x_ref[...].astype(jnp.float32)
    o_ref[...] = (x * inv_scale_ref[...] + bias_ref[...]).astype(o_ref.dtype)


def _round_up(x, m):
    return ((x + m - 1) // m) * m


def _sublane_multiple(dtype):
    # Min sublane granularity: 8 for 32-bit, 16 for 16-bit, 32 for 8-bit packing.
    return {4: 8, 2: 16, 1: 32}.get(jnp.dtype(dtype).itemsize, 8)


def _choose_tiles(rows, hw, sub, itemsize):
    """Pick (row_block, lane_block) for this HBM-bound elementwise kernel."""
    hw_pad = _round_up(hw, 128)
    # ~4 MiB blocks: amortizes the ~0.35 us per-step overhead on all generations;
    # double-buffered in + out (~16 MiB) fits under the explicit 48 MiB VMEM limit.
    target_elems = (4 * 1024 * 1024) // itemsize

    # Lane tile: lane-dense multiple of 128 (never fall back to 128-wide tiles;
    # the cdiv grid lets Pallas mask any ragged edge block).
    lane_blk = min(hw_pad, 8192)

    # Row tile: multiple of the sublane granularity, aiming at the block target.
    row_blk = max(sub, (target_elems // lane_blk) // sub * sub)
    if row_blk >= rows:
        # Rows fully covered by one block: use the exact row extent (legal block
        # shape: equals the full array dim) and grow the lane tile toward the
        # target instead so blocks stay big.
        row_blk = rows
        lane_cap = max(lane_blk, (target_elems // max(rows, 1)) // 128 * 128)
        lane_blk = min(hw_pad, lane_cap)

    # v7x megacore: keep >= 2 grid steps so both TensorCores get work
    # (no-op on v5e/v6e which have a single TC).
    if pl.cdiv(rows, row_blk) * pl.cdiv(hw, lane_blk) < 2:
        if hw > 128:
            lane_blk = _round_up(pl.cdiv(hw, 2), 128)
        elif rows > sub:
            row_blk = _round_up(pl.cdiv(rows, 2), sub)

    return row_blk, lane_blk


@functools.partial(jax.jit, donate_argnums=(0,))
def scaling_layer(x, shift, scale):
    """x: (N, C, H, W); shift/scale: (1, C, 1, 1) fixed buffers.

    x is donated: the kernel writes the normalized result in place over the
    input buffer (input_output_aliases={0: 0}).
    """
    N, C, H, W = x.shape
    rows, hw = N * C, H * W
    sub = _sublane_multiple(x.dtype)
    itemsize = jnp.dtype(x.dtype).itemsize

    row_blk, lane_blk = _choose_tiles(rows, hw, sub, itemsize)
    grid = (pl.cdiv(rows, row_blk), pl.cdiv(hw, lane_blk))

    # Lane/sublane-dense 2-D view of the NCHW input (contiguous -> bitcast, no copy).
    xf = x.reshape(rows, hw)

    # Per-row affine parameters in f32: out = x * inv_scale + bias, where
    # bias = -shift * inv_scale.  The divide happens once here, not per element.
    shift_c = shift.reshape(C).astype(jnp.float32)
    inv_scale_c = 1.0 / scale.reshape(C).astype(jnp.float32)
    inv_scale_rows = jnp.tile(inv_scale_c, N).reshape(rows, 1)
    bias_rows = jnp.tile(-shift_c * inv_scale_c, N).reshape(rows, 1)

    out = pl.pallas_call(
        _scaling_kernel,
        out_shape=jax.ShapeDtypeStruct((rows, hw), x.dtype),
        grid=grid,
        in_specs=[
            pl.BlockSpec((row_blk, lane_blk), lambda i, j: (i, j)),
            pl.BlockSpec((row_blk, 1), lambda i, j: (i, 0)),
            pl.BlockSpec((row_blk, 1), lambda i, j: (i, 0)),
        ],
        out_specs=pl.BlockSpec((row_blk, lane_blk), lambda i, j: (i, j)),
        # In-place: normalized output overwrites the donated input buffer.
        input_output_aliases={0: 0},
        compiler_params=pltpu.CompilerParams(
            dimension_semantics=("parallel", "parallel"),
            vmem_limit_bytes=48 * 1024 * 1024,
        ),
    )(xf, inv_scale_rows, bias_rows)

    return out.reshape(N, C, H, W)


if __name__ == "__main__":
    key = jax.random.PRNGKey(0)
    N, C, H, W = 2, 3, 16, 16  # C must be 3 (ScalingLayer buffers are length-3)

    x = jax.random.normal(key, (N, C, H, W), dtype=jnp.float32)

    # Fixed buffers, exactly as in ScalingLayer.__init__.
    shift = jnp.array([-0.030, -0.088, -0.188], dtype=jnp.float32).reshape(1, C, 1, 1)
    scale = jnp.array([0.458, 0.448, 0.450], dtype=jnp.float32).reshape(1, C, 1, 1)

    # Reference in plain JAX (same broadcasting as PyTorch).  Computed BEFORE
    # the kernel call because x's buffer is donated / overwritten in place.
    ref = (x - shift) / scale

    out = jax.block_until_ready(scaling_layer(x, shift, scale))

    assert out.shape == (N, C, H, W)
    # Multiply-by-reciprocal differs from the divide by ~1 ulp -> 1e-5 tolerance.
    assert jnp.allclose(out, ref, atol=1e-5, rtol=1e-5), "mismatch vs reference"

    print("KERNEL_OK")
</pallas_src>

<mosaic_0001>
module attributes {stable_mosaic.version = 11 : i64} {
  func.func @_scaling_kernel(%arg0: i32, %arg1: i32, %arg2: memref<6x128xf32, #tpu.memory_space<vmem>>, %arg3: memref<6x1xf32, #tpu.memory_space<vmem>>, %arg4: memref<6x1xf32, #tpu.memory_space<vmem>>, %arg5: memref<6x128xf32, #tpu.memory_space<vmem>>) attributes {dimension_semantics = [#tpu.dimension_semantics<parallel>, #tpu.dimension_semantics<parallel>], iteration_bounds = array<i64: 1, 2>, scalar_prefetch = 0 : i64, scratch_operands = 0 : i64, tpu.core_type = #tpu.core_type<tc>, window_params = [{transform_indices = @transform_0, window_bounds = array<i64: 6, 128>}, {transform_indices = @transform_1, window_bounds = array<i64: 6, 1>}, {transform_indices = @transform_2, window_bounds = array<i64: 6, 1>}, {transform_indices = @transform_3, window_bounds = array<i64: 6, 128>}]} {
    %c0 = arith.constant 0 : index
    %c0_0 = arith.constant 0 : index
    %0 = vector.load %arg2[%c0, %c0_0] : memref<6x128xf32, #tpu.memory_space<vmem>>, vector<6x128xf32>
    %c0_1 = arith.constant 0 : index
    %c0_2 = arith.constant 0 : index
    %1 = vector.load %arg3[%c0_1, %c0_2] : memref<6x1xf32, #tpu.memory_space<vmem>>, vector<6x1xf32>
    %2 = vector.broadcast %1 : vector<6x1xf32> to vector<6x128xf32>
    %3 = arith.mulf %0, %2 : vector<6x128xf32>
    %c0_3 = arith.constant 0 : index
    %c0_4 = arith.constant 0 : index
    %4 = vector.load %arg4[%c0_3, %c0_4] : memref<6x1xf32, #tpu.memory_space<vmem>>, vector<6x1xf32>
    %5 = vector.broadcast %4 : vector<6x1xf32> to vector<6x128xf32>
    %6 = arith.addf %3, %5 : vector<6x128xf32>
    %c0_5 = arith.constant 0 : index
    %c0_6 = arith.constant 0 : index
    %7 = vector.load %arg5[%c0_5, %c0_6] : memref<6x128xf32, #tpu.memory_space<vmem>>, vector<6x128xf32>
    tpu.vector_store %arg5[%c0_5, %c0_6], %6 {strides = array<i32>} : memref<6x128xf32, #tpu.memory_space<vmem>>, vector<6x128xf32>,
    return
  }
  func.func @transform_0(%arg0: i32, %arg1: i32) -> (i32, i32) {
    %c0_i32 = arith.constant 0 : i32
    return %arg0, %arg1 : i32, i32
  }
  func.func @transform_1(%arg0: i32, %arg1: i32) -> (i32, i32) {
    %c0_i32 = arith.constant 0 : i32
    %c0_i32_0 = arith.constant 0 : i32
    return %arg0, %c0_i32 : i32, i32
  }
  func.func @transform_2(%arg0: i32, %arg1: i32) -> (i32, i32) {
    %c0_i32 = arith.constant 0 : i32
    %c0_i32_0 = arith.constant 0 : i32
    return %arg0, %c0_i32 : i32, i32
  }
  func.func @transform_3(%arg0: i32, %arg1: i32) -> (i32, i32) {
    %c0_i32 = arith.constant 0 : i32
    return %arg0, %arg1 : i32, i32
  }
}

</mosaic_0001>

<bundles_post_ra>
// kernel: tile.0
= control target key start
LH: loop header
LB: loop body
LE: loop exit
PB: predicated region body
PF: predicated region fallthrough
CT: control target
= control target key end

     0   :  { %vm8_vm0 = vcmask 7168   ;;  %s27_s10 = smov 126   ;;  %s50_s0 = inlined_call_operand.vmem [shape: f32[2,3], index: 0, kind: input, shape index: {}]   ;;  %s51_s1 = inlined_call_operand.vmem [shape: f32[6,1], index: 1, kind: output, shape index: {}]  }
   0x1   :  { %v5_v0 = vld [vmem:[%s50_s0] sm:$0x3]  ;;  %s26_s0 = smov 127  }
   0x2   :  { %6 = vst [vmem:[#allocation0] sm:$0x3] %v5_v0 }
   0x9   :  { %v10_v1 = vld [vmem:[#allocation0] sm:$0x3]  }
   0xa   :  { %v7_v2 = vld [vmem:[#allocation0] sm:$0x3]   ;;  %11 = vrot.lane.b32.xlu0 %v10_v1, %s26_s0 }
   0xb   :  { %9 = vst.msk [vmem:[%s51_s1] ss:$3 sm:$0x3] %vm8_vm0, %v7_v2   ;;  %v16_v3 = vld [vmem:[#allocation0] sm:$0x3]  }
   0xe   :  { %17 = vrot.lane.b32.xlu0 %v16_v3, %s27_s10 }
  0x7c   :  { %v12_v4 = vpop.permute.xlu0 %11  }
  0x7d   :  { %22 = vst.msk [vmem:[%s51_s1 + $0x1] ss:$3 sm:$0x3] %vm8_vm0, %v12_v4  }
  0x80   :  { %v18_v5 = vpop.permute.xlu0 %17  }
  0x81   :  { %23 = vst.msk [vmem:[%s51_s1 + $0x2] ss:$3 sm:$0x3] %vm8_vm0, %v18_v5  }

// kernel: tile.13
= control target key start
LH: loop header
LB: loop body
LE: loop exit
PB: predicated region body
PF: predicated region fallthrough
CT: control target
= control target key end

     0   :  { %s22_s0 = inlined_call_operand.vmem [shape: f32[3], index: 0, kind: input, shape index: {}]   ;;  %s23_s1 = inlined_call_operand.vmem [shape: f32[2,3], index: 1, kind: output, shape index: {}]  }
   0x1   :  { %v4_v0 = vld [vmem:[%s22_s0] ss:$0 sm:$0xff] }
   0x2   :  { %5 = vst [vmem:[%s23_s1] sm:$0x3] %v4_v0 }

// kernel: scaling_layer.1
= control target key start
LH: loop header
LB: loop body
LE: loop exit
PB: predicated region body
PF: predicated region fallthrough
CT: control target
= control target key end

     0   :  { %s448_s12 = smov 0   ;;  %s450_s13 = smov 0   ;;  %s480_s0 = inlined_call_operand.vmem [shape: f32[6,256], index: 0, kind: input, shape index: {}, may-alias: {0,3}]   ;;  %s481_s1 = inlined_call_operand.vmem [shape: f32[6,1], index: 1, kind: input, shape index: {}]   ;;  %s482_s2 = inlined_call_operand.vmem [shape: f32[6,1], index: 2, kind: input, shape index: {}]   ;;  %s483_s3 = inlined_call_operand.vmem [shape: f32[6,256], index: 3, kind: output, shape index: {}, may-alias: {0,3}]  }
   0x1   :  { %s452_s14 = smov 0  }
   0x2 LB: > { %s22_s15 = sadd.s32 1, %s421_s13  ;;  %p372_p0 = scmp.ge.s32.totalorder %s425_s14, 1  ;;  %s425_s14 = sphi %s452_s14, %s13_s14   ;;  %s421_s13 = sphi %s450_s13, %s485_s13   ;;  %s417_s12 = sphi %s448_s12, %s484_s12  }
   0x3   : > { %p23_p1 = scmp.ge.s32.totalorder %s22_s15, 2  ;;  %p174_p2 = scmp.lt.s32.totalorder %s425_s14, 3 }
   0x5   : > { %s487_s15 = smov (%p23_p1, %s22_s15), 0  ;;  %p175_p3 = pnand %p372_p0, %p174_p2 }
   0x6   : > { %p214_p4 = scmp.lt.s32.totalorder (!%p175_p3), %s417_s12, 1 }
   0x7   : > { %178 = sbr.rel (%p175_p3) target bundleno = 145 (0x91), region = 32 }
   0xc   : > { %v237_v0 = vld [vmem:[%s481_s1] sm:$0x3f]  ;;  %v427_v1 = vmov 0   ;;  %s489_s12 = smov (!%p214_p4, %s417_s12), 1 }
   0xd   : > { %402 = vset.pattern.permute.xlu0 %v427_v1  ;;  %v244_v2 = vld [vmem:[%s482_s2] sm:$0x3f]  ;;  %s373_s20 = sshll.u32 %s489_s12, 3 }
   0xe   : > { %240 = vperm.xlu0 %402, %v237_v0   ;;  %s219_s23 = scalar_lea.vmem %s480_s0, %s373_s20  ;;  %s235_s26 = scalar_lea.vmem %s483_s3, %s373_s20 }
   0xf   : > { %v236_v4 = vld [vmem:[%s219_s23] sm:$0x3f] }
  0x12   : > { %247 = vperm.xlu0 %402, %v244_v2  }
  0x89   : > { %v241_v3 = vpop.permute.xlu0 %240 }
  0x8a   : > { %v243_v5 = vmul.f32 %v241_v3, %v236_v4 }
  0x8d   : > { %v248_v6 = vpop.permute.xlu0 %247 }
  0x8e   : > { %v250_v7 = vadd.f32 %v248_v6, %v243_v5 }
  0x90   : > { %251 = vst [vmem:[%s235_s26] sm:$0x3f] %v250_v7 }
  0x91 PF: > { %s13_s14 = sadd.s32 1, %s425_s14   ;;  %s484_s12 = smov %s421_s13 }
  0x92   : > { %p10_p5 = scmp.ge.s32.totalorder %s13_s14, 4   ;;  %s485_s13 = smov %s487_s15 }
  0x94   :  { %12 = sbr.rel (!%p10_p5) target bundleno = 2 (0x2), region = 68 }

</bundles_post_ra>
